<compile_context>
chip_gen: v6e
topology: v6e:2x2x1
jax: 0.10.0
libtpu: 0.0.40
codegen_flags: <defaults>
</compile_context>

<pallas_src>
import functools
import math

import jax
import jax.numpy as jnp
from jax.experimental import pallas as pl
from jax.experimental.pallas import tpu as pltpu


def _round_up(x, m):
    return ((x + m - 1) // m) * m


# -----------------------------------------------------------------------------
# Fused kernel: all agents' MLPs + VDN sum for one batch tile.
# -----------------------------------------------------------------------------
def _fused_vdn_kernel(x_ref, w_obs_ref, b_obs_ref, wh_ref, bh_ref,
                      wq_ref, bq_ref, q_cat_ref, q_tot_ref, *,
                      agent_count, hidden_layer_count, act_pad, compute_dtype):
    """
    x_ref     : (A, TB, obs_max)       bf16  per-agent observations (batch tile)
    w_obs_ref : (A, obs_max, H_pad)    bf16
    b_obs_ref : (A, 1, H_pad)          f32
    wh_ref    : (A, L, H_pad, H_pad)   bf16
    bh_ref    : (A, L, 1, H_pad)       f32
    wq_ref    : (A, H_pad, act_pad)    bf16
    bq_ref    : (A, 1, act_pad)        f32
    q_cat_ref : (TB, A*act_pad)        f32  lane-dense concatenated q values
    q_tot_ref : (TB, 1)                f32  VDN mixed q (sum over agents/actions)
    """
    q_total = None
    # agent_count / hidden_layer_count are static Python ints -> unrolled.
    for a in range(agent_count):
        h = jnp.dot(x_ref[a], w_obs_ref[a],
                    preferred_element_type=jnp.float32) + b_obs_ref[a]
        h = jnp.maximum(h, 0.0)
        for j in range(hidden_layer_count):
            h = jnp.dot(h.astype(compute_dtype), wh_ref[a, j],
                        preferred_element_type=jnp.float32) + bh_ref[a, j]
            h = jnp.maximum(h, 0.0)
        q = jnp.dot(h.astype(compute_dtype), wq_ref[a],
                    preferred_element_type=jnp.float32) + bq_ref[a]
        # 128-aligned static column slice -> unmasked, lane-dense store.
        q_cat_ref[:, a * act_pad:(a + 1) * act_pad] = q
        s = jnp.sum(q, axis=1, keepdims=True)   # padded action cols are exactly 0
        q_total = s if q_total is None else q_total + s
    q_tot_ref[...] = q_total


def fused_vdn_forward(x_stack, params, *, hidden_layer_count, tile_b):
    """x_stack: (A, B_pad, obs_max) bf16 with B_pad % tile_b == 0."""
    A, B_pad, obs_max = x_stack.shape
    w_obs_all, b_obs_all, wh_all, bh_all, wq_all, bq_all = params
    act_pad = wq_all.shape[-1]

    kernel = functools.partial(
        _fused_vdn_kernel,
        agent_count=A,
        hidden_layer_count=hidden_layer_count,
        act_pad=act_pad,
        compute_dtype=jnp.bfloat16,
    )

    const3 = lambda b: (0, 0, 0)
    const4 = lambda b: (0, 0, 0, 0)

    grid_spec = pltpu.PrefetchScalarGridSpec(
        num_scalar_prefetch=0,
        grid=(B_pad // tile_b,),
        in_specs=[
            # Observations: streamed per batch tile.
            pl.BlockSpec((A, tile_b, obs_max), lambda b: (0, b, 0)),
            # Stacked parameters: constant index_map -> fetched once, stay
            # resident in VMEM for the whole grid.
            pl.BlockSpec(w_obs_all.shape, const3),
            pl.BlockSpec(b_obs_all.shape, const3),
            pl.BlockSpec(wh_all.shape, const4),
            pl.BlockSpec(bh_all.shape, const4),
            pl.BlockSpec(wq_all.shape, const3),
            pl.BlockSpec(bq_all.shape, const3),
        ],
        out_specs=[
            pl.BlockSpec((tile_b, A * act_pad), lambda b: (b, 0)),
            pl.BlockSpec((tile_b, 1), lambda b: (b, 0)),
        ],
    )

    q_cat, q_tot = pl.pallas_call(
        kernel,
        out_shape=(
            jax.ShapeDtypeStruct((B_pad, A * act_pad), jnp.float32),
            jax.ShapeDtypeStruct((B_pad, 1), jnp.float32),
        ),
        grid_spec=grid_spec,
        compiler_params=pltpu.CompilerParams(
            dimension_semantics=("parallel",)),
    )(x_stack, w_obs_all, b_obs_all, wh_all, bh_all, wq_all, bq_all)
    return q_cat, q_tot


# -----------------------------------------------------------------------------
# Module wrapper mirroring DNN.__init__/_define_parameters/forward/mix_q
# -----------------------------------------------------------------------------
class DNNPallas:

    def __init__(self, agent_count, observation_dim_list, action_dim_list,
                 hidden_dim, hidden_layer_count, key):
        self.agent_count = agent_count
        self.observation_dim_list = list(observation_dim_list)
        self.action_dim_list = list(action_dim_list)
        self.hidden_dim = hidden_dim
        self.hidden_layer_count = hidden_layer_count

        self.H_pad = _round_up(hidden_dim, 128)
        self.obs_max = max(self.observation_dim_list)
        self.act_pad = _round_up(max(self.action_dim_list), 128)
        A = agent_count
        H = hidden_dim
        L = max(hidden_layer_count, 1)

        # Zero-padded stacked parameter slabs (padding contributes exactly 0).
        w_obs = jnp.zeros((A, self.obs_max, self.H_pad), jnp.float32)
        b_obs = jnp.zeros((A, 1, self.H_pad), jnp.float32)
        wh = jnp.zeros((A, L, self.H_pad, self.H_pad), jnp.float32)
        bh = jnp.zeros((A, L, 1, self.H_pad), jnp.float32)
        wq = jnp.zeros((A, self.H_pad, self.act_pad), jnp.float32)
        bq = jnp.zeros((A, 1, self.act_pad), jnp.float32)

        # PyTorch nn.Linear default init: U(-1/sqrt(fan_in), 1/sqrt(fan_in)),
        # weights stored pre-transposed to (in, out) so the kernel does x @ W.
        for i in range(A):
            obs_d = self.observation_dim_list[i]
            act_d = self.action_dim_list[i]
            key, k_wo, k_bo, k_wq, k_bq = jax.random.split(key, 5)
            bnd = 1.0 / math.sqrt(obs_d)
            w_obs = w_obs.at[i, :obs_d, :H].set(
                jax.random.uniform(k_wo, (obs_d, H), jnp.float32, -bnd, bnd))
            b_obs = b_obs.at[i, 0, :H].set(
                jax.random.uniform(k_bo, (H,), jnp.float32, -bnd, bnd))
            bnd_h = 1.0 / math.sqrt(H)
            for j in range(hidden_layer_count):
                key, k_w, k_b = jax.random.split(key, 3)
                wh = wh.at[i, j, :H, :H].set(
                    jax.random.uniform(k_w, (H, H), jnp.float32, -bnd_h, bnd_h))
                bh = bh.at[i, j, 0, :H].set(
                    jax.random.uniform(k_b, (H,), jnp.float32, -bnd_h, bnd_h))
            wq = wq.at[i, :H, :act_d].set(
                jax.random.uniform(k_wq, (H, act_d), jnp.float32, -bnd_h, bnd_h))
            bq = bq.at[i, 0, :act_d].set(
                jax.random.uniform(k_bq, (act_d,), jnp.float32, -bnd_h, bnd_h))

        # bf16 weights (halve DMA bytes, bf16 MXU path); f32 biases (added to
        # the f32 MXU accumulators).
        self.w_obs_all = w_obs.astype(jnp.bfloat16)
        self.b_obs_all = b_obs
        self.wh_all = wh.astype(jnp.bfloat16)
        self.bh_all = bh
        self.wq_all = wq.astype(jnp.bfloat16)
        self.bq_all = bq

    # -- helpers ---------------------------------------------------------------
    def _stack_observations(self, observation_list):
        B = observation_list[0].shape[0]
        tile_b = min(512, _round_up(B, 8))       # MXU M multiple of 8, <=512
        b_pad = _round_up(B, tile_b)
        x = jnp.zeros((self.agent_count, b_pad, self.obs_max), jnp.float32)
        for i, obs in enumerate(observation_list):
            x = x.at[i, :B, :obs.shape[1]].set(obs)
        return x.astype(jnp.bfloat16), B, tile_b

    def _params(self):
        return (self.w_obs_all, self.b_obs_all, self.wh_all, self.bh_all,
                self.wq_all, self.bq_all)

    # -- API matching the PyTorch module ---------------------------------------
    def forward_and_mix(self, observation_list):
        """Fused path: returns (q_list, q_total) from a single pallas_call."""
        x_stack, B, tile_b = self._stack_observations(observation_list)
        q_cat, q_tot = fused_vdn_forward(
            x_stack, self._params(),
            hidden_layer_count=self.hidden_layer_count, tile_b=tile_b)
        q_list = [
            q_cat[:B, i * self.act_pad:i * self.act_pad + self.action_dim_list[i]]
            for i in range(self.agent_count)
        ]
        return q_list, q_tot[:B]

    def forward(self, observation_list):
        q_list, _ = self.forward_and_mix(observation_list)
        return q_list

    def mix_q(self, q_list):
        # MixQ_VDN on an arbitrary q_list: a (B, sum_act)->(B,1) sum is far
        # below per-call overhead, so plain JAX (the fused kernel already
        # emits the same value as the second output of forward_and_mix).
        return jnp.sum(jnp.concatenate(q_list, axis=1), axis=1, keepdims=True)


# -----------------------------------------------------------------------------
# Pure-JAX reference (same bf16 weights / f32 accumulation as the kernel)
# -----------------------------------------------------------------------------
def _ref_forward_mix(model, observation_list):
    q_list = []
    for i in range(model.agent_count):
        obs = observation_list[i]
        x = jnp.zeros((obs.shape[0], model.obs_max), jnp.float32)
        x = x.at[:, :obs.shape[1]].set(obs).astype(jnp.bfloat16)
        h = jnp.dot(x, model.w_obs_all[i],
                    preferred_element_type=jnp.float32) + model.b_obs_all[i]
        h = jnp.maximum(h, 0.0)
        for j in range(model.hidden_layer_count):
            h = jnp.dot(h.astype(jnp.bfloat16), model.wh_all[i, j],
                        preferred_element_type=jnp.float32) + model.bh_all[i, j]
            h = jnp.maximum(h, 0.0)
        q = jnp.dot(h.astype(jnp.bfloat16), model.wq_all[i],
                    preferred_element_type=jnp.float32) + model.bq_all[i]
        q_list.append(q[:, :model.action_dim_list[i]])
    q_tot = jnp.sum(jnp.concatenate(q_list, axis=1), axis=1, keepdims=True)
    return q_list, q_tot


if __name__ == "__main__":
    agent_count = 3
    observation_dim_list = [10, 12, 8]
    action_dim_list = [5, 4, 6]
    hidden_dim = 32
    hidden_layer_count = 2
    batch = 2

    key = jax.random.PRNGKey(0)
    key, pkey = jax.random.split(key)
    model = DNNPallas(agent_count, observation_dim_list, action_dim_list,
                      hidden_dim, hidden_layer_count, pkey)

    obs_list = []
    for i in range(agent_count):
        key, sub = jax.random.split(key)
        obs_list.append(
            jax.random.normal(sub, (batch, observation_dim_list[i]),
                              jnp.float32))

    q_list, q_total = model.forward_and_mix(obs_list)
    q_total = jax.block_until_ready(q_total)

    # correctness check against plain-JAX reference (same precision path)
    q_ref_list, q_ref_total = _ref_forward_mix(model, obs_list)
    for i, (q, qr) in enumerate(zip(q_list, q_ref_list)):
        assert q.shape == (batch, action_dim_list[i])
        assert jnp.allclose(q, qr, atol=1e-3), "agent q mismatch"
    assert q_total.shape == (batch, 1)
    assert jnp.allclose(q_total, q_ref_total, atol=1e-3), "fused mixer mismatch"
    assert jnp.allclose(model.mix_q(q_list), q_total, atol=1e-3), \
        "mix_q mismatch"

    print("KERNEL_OK")
</pallas_src>

<mosaic_0001>
module attributes {stable_mosaic.version = 11 : i64} {
  func.func @_fused_vdn_kernel(%arg0: i32, %arg1: memref<3x8x12xbf16, #tpu.memory_space<vmem>>, %arg2: memref<3x12x128xbf16, #tpu.memory_space<vmem>>, %arg3: memref<3x1x128xf32, #tpu.memory_space<vmem>>, %arg4: memref<3x2x128x128xbf16, #tpu.memory_space<vmem>>, %arg5: memref<3x2x1x128xf32, #tpu.memory_space<vmem>>, %arg6: memref<3x128x128xbf16, #tpu.memory_space<vmem>>, %arg7: memref<3x1x128xf32, #tpu.memory_space<vmem>>, %arg8: memref<8x384xf32, #tpu.memory_space<vmem>>, %arg9: memref<8x1xf32, #tpu.memory_space<vmem>>) attributes {dimension_semantics = [#tpu.dimension_semantics<parallel>], iteration_bounds = array<i64: 1>, scalar_prefetch = 0 : i64, scratch_operands = 0 : i64, tpu.core_type = #tpu.core_type<tc>, window_params = [{transform_indices = @transform_0, window_bounds = array<i64: 3, 8, 12>}, {pipeline_mode = #tpu.pipeline_mode<synchronous>, transform_indices = @transform_1, window_bounds = array<i64: 3, 12, 128>}, {pipeline_mode = #tpu.pipeline_mode<synchronous>, transform_indices = @transform_2, window_bounds = array<i64: 3, 1, 128>}, {pipeline_mode = #tpu.pipeline_mode<synchronous>, transform_indices = @transform_3, window_bounds = array<i64: 3, 2, 128, 128>}, {pipeline_mode = #tpu.pipeline_mode<synchronous>, transform_indices = @transform_4, window_bounds = array<i64: 3, 2, 1, 128>}, {pipeline_mode = #tpu.pipeline_mode<synchronous>, transform_indices = @transform_5, window_bounds = array<i64: 3, 128, 128>}, {pipeline_mode = #tpu.pipeline_mode<synchronous>, transform_indices = @transform_6, window_bounds = array<i64: 3, 1, 128>}, {transform_indices = @transform_7, window_bounds = array<i64: 8, 384>}, {transform_indices = @transform_8, window_bounds = array<i64: 8, 1>}]} {
    %c0 = arith.constant 0 : index
    %c0_0 = arith.constant 0 : index
    %c0_1 = arith.constant 0 : index
    %0 = vector.load %arg1[%c0, %c0_0, %c0_1] : memref<3x8x12xbf16, #tpu.memory_space<vmem>>, vector<1x8x12xbf16>
    %1 = vector.shape_cast %0 : vector<1x8x12xbf16> to vector<8x12xbf16>
    %c0_2 = arith.constant 0 : index
    %c0_3 = arith.constant 0 : index
    %c0_4 = arith.constant 0 : index
    %2 = vector.load %arg2[%c0_2, %c0_3, %c0_4] : memref<3x12x128xbf16, #tpu.memory_space<vmem>>, vector<1x12x128xbf16>
    %3 = vector.shape_cast %2 : vector<1x12x128xbf16> to vector<12x128xbf16>
    %cst = arith.constant dense<0.000000e+00> : vector<8x128xf32>
    %4 = tpu.matmul %1, %3, %cst {dimension_numbers = #tpu.dot_dimension_numbers<[1], [0], [0], [1], [0, 0, 1, 1], [], []>} : vector<8x12xbf16>, vector<12x128xbf16>, vector<8x128xf32> -> vector<8x128xf32>
    %c0_5 = arith.constant 0 : index
    %c0_6 = arith.constant 0 : index
    %c0_7 = arith.constant 0 : index
    %5 = vector.load %arg3[%c0_5, %c0_6, %c0_7] : memref<3x1x128xf32, #tpu.memory_space<vmem>>, vector<1x1x128xf32>
    %6 = vector.shape_cast %5 : vector<1x1x128xf32> to vector<1x128xf32>
    %7 = vector.broadcast %6 : vector<1x128xf32> to vector<8x128xf32>
    %8 = arith.addf %4, %7 : vector<8x128xf32>
    %cst_8 = arith.constant 0.000000e+00 : f32
    %9 = vector.broadcast %cst_8 : f32 to vector<8x128xf32>
    %10 = arith.maximumf %8, %9 : vector<8x128xf32>
    %11 = arith.truncf %10 : vector<8x128xf32> to vector<8x128xbf16>
    %c0_9 = arith.constant 0 : index
    %c0_10 = arith.constant 0 : index
    %c0_11 = arith.constant 0 : index
    %c0_12 = arith.constant 0 : index
    %12 = vector.load %arg4[%c0_9, %c0_10, %c0_11, %c0_12] : memref<3x2x128x128xbf16, #tpu.memory_space<vmem>>, vector<1x1x128x128xbf16>
    %13 = vector.shape_cast %12 : vector<1x1x128x128xbf16> to vector<128x128xbf16>
    %cst_13 = arith.constant dense<0.000000e+00> : vector<8x128xf32>
    %14 = tpu.matmul %11, %13, %cst_13 {dimension_numbers = #tpu.dot_dimension_numbers<[1], [0], [0], [1], [0, 0, 1, 1], [], []>} : vector<8x128xbf16>, vector<128x128xbf16>, vector<8x128xf32> -> vector<8x128xf32>
    %c0_14 = arith.constant 0 : index
    %c0_15 = arith.constant 0 : index
    %c0_16 = arith.constant 0 : index
    %c0_17 = arith.constant 0 : index
    %15 = vector.load %arg5[%c0_14, %c0_15, %c0_16, %c0_17] : memref<3x2x1x128xf32, #tpu.memory_space<vmem>>, vector<1x1x1x128xf32>
    %16 = vector.shape_cast %15 : vector<1x1x1x128xf32> to vector<1x128xf32>
    %17 = vector.broadcast %16 : vector<1x128xf32> to vector<8x128xf32>
    %18 = arith.addf %14, %17 : vector<8x128xf32>
    %cst_18 = arith.constant 0.000000e+00 : f32
    %19 = vector.broadcast %cst_18 : f32 to vector<8x128xf32>
    %20 = arith.maximumf %18, %19 : vector<8x128xf32>
    %21 = arith.truncf %20 : vector<8x128xf32> to vector<8x128xbf16>
    %c0_19 = arith.constant 0 : index
    %c1 = arith.constant 1 : index
    %c0_20 = arith.constant 0 : index
    %c0_21 = arith.constant 0 : index
    %22 = vector.load %arg4[%c0_19, %c1, %c0_20, %c0_21] : memref<3x2x128x128xbf16, #tpu.memory_space<vmem>>, vector<1x1x128x128xbf16>
    %23 = vector.shape_cast %22 : vector<1x1x128x128xbf16> to vector<128x128xbf16>
    %cst_22 = arith.constant dense<0.000000e+00> : vector<8x128xf32>
    %24 = tpu.matmul %21, %23, %cst_22 {dimension_numbers = #tpu.dot_dimension_numbers<[1], [0], [0], [1], [0, 0, 1, 1], [], []>} : vector<8x128xbf16>, vector<128x128xbf16>, vector<8x128xf32> -> vector<8x128xf32>
    %c0_23 = arith.constant 0 : index
    %c1_24 = arith.constant 1 : index
    %c0_25 = arith.constant 0 : index
    %c0_26 = arith.constant 0 : index
    %25 = vector.load %arg5[%c0_23, %c1_24, %c0_25, %c0_26] : memref<3x2x1x128xf32, #tpu.memory_space<vmem>>, vector<1x1x1x128xf32>
    %26 = vector.shape_cast %25 : vector<1x1x1x128xf32> to vector<1x128xf32>
    %27 = vector.broadcast %26 : vector<1x128xf32> to vector<8x128xf32>
    %28 = arith.addf %24, %27 : vector<8x128xf32>
    %cst_27 = arith.constant 0.000000e+00 : f32
    %29 = vector.broadcast %cst_27 : f32 to vector<8x128xf32>
    %30 = arith.maximumf %28, %29 : vector<8x128xf32>
    %31 = arith.truncf %30 : vector<8x128xf32> to vector<8x128xbf16>
    %c0_28 = arith.constant 0 : index
    %c0_29 = arith.constant 0 : index
    %c0_30 = arith.constant 0 : index
    %32 = vector.load %arg6[%c0_28, %c0_29, %c0_30] : memref<3x128x128xbf16, #tpu.memory_space<vmem>>, vector<1x128x128xbf16>
    %33 = vector.shape_cast %32 : vector<1x128x128xbf16> to vector<128x128xbf16>
    %cst_31 = arith.constant dense<0.000000e+00> : vector<8x128xf32>
    %34 = tpu.matmul %31, %33, %cst_31 {dimension_numbers = #tpu.dot_dimension_numbers<[1], [0], [0], [1], [0, 0, 1, 1], [], []>} : vector<8x128xbf16>, vector<128x128xbf16>, vector<8x128xf32> -> vector<8x128xf32>
    %c0_32 = arith.constant 0 : index
    %c0_33 = arith.constant 0 : index
    %c0_34 = arith.constant 0 : index
    %35 = vector.load %arg7[%c0_32, %c0_33, %c0_34] : memref<3x1x128xf32, #tpu.memory_space<vmem>>, vector<1x1x128xf32>
    %36 = vector.shape_cast %35 : vector<1x1x128xf32> to vector<1x128xf32>
    %37 = vector.broadcast %36 : vector<1x128xf32> to vector<8x128xf32>
    %38 = arith.addf %34, %37 : vector<8x128xf32>
    %c0_35 = arith.constant 0 : index
    %c0_36 = arith.constant 0 : index
    %39 = vector.load %arg8[%c0_35, %c0_36] : memref<8x384xf32, #tpu.memory_space<vmem>>, vector<8x128xf32>
    tpu.vector_store %arg8[%c0_35, %c0_36], %38 {strides = array<i32>} : memref<8x384xf32, #tpu.memory_space<vmem>>, vector<8x128xf32>,
    %cst_37 = arith.constant dense<0.000000e+00> : vector<8xf32>
    %40 = vector.multi_reduction <add>, %38, %cst_37 [1] : vector<8x128xf32> to vector<8xf32>
    %41 = vector.shape_cast %40 : vector<8xf32> to vector<8x1xf32>
    %c1_38 = arith.constant 1 : index
    %c0_39 = arith.constant 0 : index
    %c0_40 = arith.constant 0 : index
    %42 = vector.load %arg1[%c1_38, %c0_39, %c0_40] : memref<3x8x12xbf16, #tpu.memory_space<vmem>>, vector<1x8x12xbf16>
    %43 = vector.shape_cast %42 : vector<1x8x12xbf16> to vector<8x12xbf16>
    %c1_41 = arith.constant 1 : index
    %c0_42 = arith.constant 0 : index
    %c0_43 = arith.constant 0 : index
    %44 = vector.load %arg2[%c1_41, %c0_42, %c0_43] : memref<3x12x128xbf16, #tpu.memory_space<vmem>>, vector<1x12x128xbf16>
    %45 = vector.shape_cast %44 : vector<1x12x128xbf16> to vector<12x128xbf16>
    %cst_44 = arith.constant dense<0.000000e+00> : vector<8x128xf32>
    %46 = tpu.matmul %43, %45, %cst_44 {dimension_numbers = #tpu.dot_dimension_numbers<[1], [0], [0], [1], [0, 0, 1, 1], [], []>} : vector<8x12xbf16>, vector<12x128xbf16>, vector<8x128xf32> -> vector<8x128xf32>
    %c1_45 = arith.constant 1 : index
    %c0_46 = arith.constant 0 : index
    %c0_47 = arith.constant 0 : index
    %47 = vector.load %arg3[%c1_45, %c0_46, %c0_47] : memref<3x1x128xf32, #tpu.memory_space<vmem>>, vector<1x1x128xf32>
    %48 = vector.shape_cast %47 : vector<1x1x128xf32> to vector<1x128xf32>
    %49 = vector.broadcast %48 : vector<1x128xf32> to vector<8x128xf32>
    %50 = arith.addf %46, %49 : vector<8x128xf32>
    %cst_48 = arith.constant 0.000000e+00 : f32
    %51 = vector.broadcast %cst_48 : f32 to vector<8x128xf32>
    %52 = arith.maximumf %50, %51 : vector<8x128xf32>
    %53 = arith.truncf %52 : vector<8x128xf32> to vector<8x128xbf16>
    %c1_49 = arith.constant 1 : index
    %c0_50 = arith.constant 0 : index
    %c0_51 = arith.constant 0 : index
    %c0_52 = arith.constant 0 : index
    %54 = vector.load %arg4[%c1_49, %c0_50, %c0_51, %c0_52] : memref<3x2x128x128xbf16, #tpu.memory_space<vmem>>, vector<1x1x128x128xbf16>
    %55 = vector.shape_cast %54 : vector<1x1x128x128xbf16> to vector<128x128xbf16>
    %cst_53 = arith.constant dense<0.000000e+00> : vector<8x128xf32>
    %56 = tpu.matmul %53, %55, %cst_53 {dimension_numbers = #tpu.dot_dimension_numbers<[1], [0], [0], [1], [0, 0, 1, 1], [], []>} : vector<8x128xbf16>, vector<128x128xbf16>, vector<8x128xf32> -> vector<8x128xf32>
    %c1_54 = arith.constant 1 : index
    %c0_55 = arith.constant 0 : index
    %c0_56 = arith.constant 0 : index
    %c0_57 = arith.constant 0 : index
    %57 = vector.load %arg5[%c1_54, %c0_55, %c0_56, %c0_57] : memref<3x2x1x128xf32, #tpu.memory_space<vmem>>, vector<1x1x1x128xf32>
    %58 = vector.shape_cast %57 : vector<1x1x1x128xf32> to vector<1x128xf32>
    %59 = vector.broadcast %58 : vector<1x128xf32> to vector<8x128xf32>
    %60 = arith.addf %56, %59 : vector<8x128xf32>
    %cst_58 = arith.constant 0.000000e+00 : f32
    %61 = vector.broadcast %cst_58 : f32 to vector<8x128xf32>
    %62 = arith.maximumf %60, %61 : vector<8x128xf32>
    %63 = arith.truncf %62 : vector<8x128xf32> to vector<8x128xbf16>
    %c1_59 = arith.constant 1 : index
    %c1_60 = arith.constant 1 : index
    %c0_61 = arith.constant 0 : index
    %c0_62 = arith.constant 0 : index
    %64 = vector.load %arg4[%c1_59, %c1_60, %c0_61, %c0_62] : memref<3x2x128x128xbf16, #tpu.memory_space<vmem>>, vector<1x1x128x128xbf16>
    %65 = vector.shape_cast %64 : vector<1x1x128x128xbf16> to vector<128x128xbf16>
    %cst_63 = arith.constant dense<0.000000e+00> : vector<8x128xf32>
    %66 = tpu.matmul %63, %65, %cst_63 {dimension_numbers = #tpu.dot_dimension_numbers<[1], [0], [0], [1], [0, 0, 1, 1], [], []>} : vector<8x128xbf16>, vector<128x128xbf16>, vector<8x128xf32> -> vector<8x128xf32>
    %c1_64 = arith.constant 1 : index
    %c1_65 = arith.constant 1 : index
    %c0_66 = arith.constant 0 : index
    %c0_67 = arith.constant 0 : index
    %67 = vector.load %arg5[%c1_64, %c1_65, %c0_66, %c0_67] : memref<3x2x1x128xf32, #tpu.memory_space<vmem>>, vector<1x1x1x128xf32>
    %68 = vector.shape_cast %67 : vector<1x1x1x128xf32> to vector<1x128xf32>
    %69 = vector.broadcast %68 : vector<1x128xf32> to vector<8x128xf32>
    %70 = arith.addf %66, %69 : vector<8x128xf32>
    %cst_68 = arith.constant 0.000000e+00 : f32
    %71 = vector.broadcast %cst_68 : f32 to vector<8x128xf32>
    %72 = arith.maximumf %70, %71 : vector<8x128xf32>
    %73 = arith.truncf %72 : vector<8x128xf32> to vector<8x128xbf16>
    %c1_69 = arith.constant 1 : index
    %c0_70 = arith.constant 0 : index
    %c0_71 = arith.constant 0 : index
    %74 = vector.load %arg6[%c1_69, %c0_70, %c0_71] : memref<3x128x128xbf16, #tpu.memory_space<vmem>>, vector<1x128x128xbf16>
    %75 = vector.shape_cast %74 : vector<1x128x128xbf16> to vector<128x128xbf16>
    %cst_72 = arith.constant dense<0.000000e+00> : vector<8x128xf32>
    %76 = tpu.matmul %73, %75, %cst_72 {dimension_numbers = #tpu.dot_dimension_numbers<[1], [0], [0], [1], [0, 0, 1, 1], [], []>} : vector<8x128xbf16>, vector<128x128xbf16>, vector<8x128xf32> -> vector<8x128xf32>
    %c1_73 = arith.constant 1 : index
    %c0_74 = arith.constant 0 : index
    %c0_75 = arith.constant 0 : index
    %77 = vector.load %arg7[%c1_73, %c0_74, %c0_75] : memref<3x1x128xf32, #tpu.memory_space<vmem>>, vector<1x1x128xf32>
    %78 = vector.shape_cast %77 : vector<1x1x128xf32> to vector<1x128xf32>
    %79 = vector.broadcast %78 : vector<1x128xf32> to vector<8x128xf32>
    %80 = arith.addf %76, %79 : vector<8x128xf32>
    %c0_76 = arith.constant 0 : index
    %c128 = arith.constant 128 : index
    %81 = vector.load %arg8[%c0_76, %c128] : memref<8x384xf32, #tpu.memory_space<vmem>>, vector<8x128xf32>
    tpu.vector_store %arg8[%c0_76, %c128], %80 {strides = array<i32>} : memref<8x384xf32, #tpu.memory_space<vmem>>, vector<8x128xf32>,
    %cst_77 = arith.constant dense<0.000000e+00> : vector<8xf32>
    %82 = vector.multi_reduction <add>, %80, %cst_77 [1] : vector<8x128xf32> to vector<8xf32>
    %83 = vector.shape_cast %82 : vector<8xf32> to vector<8x1xf32>
    %84 = arith.addf %41, %83 : vector<8x1xf32>
    %c2 = arith.constant 2 : index
    %c0_78 = arith.constant 0 : index
    %c0_79 = arith.constant 0 : index
    %85 = vector.load %arg1[%c2, %c0_78, %c0_79] : memref<3x8x12xbf16, #tpu.memory_space<vmem>>, vector<1x8x12xbf16>
    %86 = vector.shape_cast %85 : vector<1x8x12xbf16> to vector<8x12xbf16>
    %c2_80 = arith.constant 2 : index
    %c0_81 = arith.constant 0 : index
    %c0_82 = arith.constant 0 : index
    %87 = vector.load %arg2[%c2_80, %c0_81, %c0_82] : memref<3x12x128xbf16, #tpu.memory_space<vmem>>, vector<1x12x128xbf16>
    %88 = vector.shape_cast %87 : vector<1x12x128xbf16> to vector<12x128xbf16>
    %cst_83 = arith.constant dense<0.000000e+00> : vector<8x128xf32>
    %89 = tpu.matmul %86, %88, %cst_83 {dimension_numbers = #tpu.dot_dimension_numbers<[1], [0], [0], [1], [0, 0, 1, 1], [], []>} : vector<8x12xbf16>, vector<12x128xbf16>, vector<8x128xf32> -> vector<8x128xf32>
    %c2_84 = arith.constant 2 : index
    %c0_85 = arith.constant 0 : index
    %c0_86 = arith.constant 0 : index
    %90 = vector.load %arg3[%c2_84, %c0_85, %c0_86] : memref<3x1x128xf32, #tpu.memory_space<vmem>>, vector<1x1x128xf32>
    %91 = vector.shape_cast %90 : vector<1x1x128xf32> to vector<1x128xf32>
    %92 = vector.broadcast %91 : vector<1x128xf32> to vector<8x128xf32>
    %93 = arith.addf %89, %92 : vector<8x128xf32>
    %cst_87 = arith.constant 0.000000e+00 : f32
    %94 = vector.broadcast %cst_87 : f32 to vector<8x128xf32>
    %95 = arith.maximumf %93, %94 : vector<8x128xf32>
    %96 = arith.truncf %95 : vector<8x128xf32> to vector<8x128xbf16>
    %c2_88 = arith.constant 2 : index
    %c0_89 = arith.constant 0 : index
    %c0_90 = arith.constant 0 : index
    %c0_91 = arith.constant 0 : index
    %97 = vector.load %arg4[%c2_88, %c0_89, %c0_90, %c0_91] : memref<3x2x128x128xbf16, #tpu.memory_space<vmem>>, vector<1x1x128x128xbf16>
    %98 = vector.shape_cast %97 : vector<1x1x128x128xbf16> to vector<128x128xbf16>
    %cst_92 = arith.constant dense<0.000000e+00> : vector<8x128xf32>
    %99 = tpu.matmul %96, %98, %cst_92 {dimension_numbers = #tpu.dot_dimension_numbers<[1], [0], [0], [1], [0, 0, 1, 1], [], []>} : vector<8x128xbf16>, vector<128x128xbf16>, vector<8x128xf32> -> vector<8x128xf32>
    %c2_93 = arith.constant 2 : index
    %c0_94 = arith.constant 0 : index
    %c0_95 = arith.constant 0 : index
    %c0_96 = arith.constant 0 : index
    %100 = vector.load %arg5[%c2_93, %c0_94, %c0_95, %c0_96] : memref<3x2x1x128xf32, #tpu.memory_space<vmem>>, vector<1x1x1x128xf32>
    %101 = vector.shape_cast %100 : vector<1x1x1x128xf32> to vector<1x128xf32>
    %102 = vector.broadcast %101 : vector<1x128xf32> to vector<8x128xf32>
    %103 = arith.addf %99, %102 : vector<8x128xf32>
    %cst_97 = arith.constant 0.000000e+00 : f32
    %104 = vector.broadcast %cst_97 : f32 to vector<8x128xf32>
    %105 = arith.maximumf %103, %104 : vector<8x128xf32>
    %106 = arith.truncf %105 : vector<8x128xf32> to vector<8x128xbf16>
    %c2_98 = arith.constant 2 : index
    %c1_99 = arith.constant 1 : index
    %c0_100 = arith.constant 0 : index
    %c0_101 = arith.constant 0 : index
    %107 = vector.load %arg4[%c2_98, %c1_99, %c0_100, %c0_101] : memref<3x2x128x128xbf16, #tpu.memory_space<vmem>>, vector<1x1x128x128xbf16>
    %108 = vector.shape_cast %107 : vector<1x1x128x128xbf16> to vector<128x128xbf16>
    %cst_102 = arith.constant dense<0.000000e+00> : vector<8x128xf32>
    %109 = tpu.matmul %106, %108, %cst_102 {dimension_numbers = #tpu.dot_dimension_numbers<[1], [0], [0], [1], [0, 0, 1, 1], [], []>} : vector<8x128xbf16>, vector<128x128xbf16>, vector<8x128xf32> -> vector<8x128xf32>
    %c2_103 = arith.constant 2 : index
    %c1_104 = arith.constant 1 : index
    %c0_105 = arith.constant 0 : index
    %c0_106 = arith.constant 0 : index
    %110 = vector.load %arg5[%c2_103, %c1_104, %c0_105, %c0_106] : memref<3x2x1x128xf32, #tpu.memory_space<vmem>>, vector<1x1x1x128xf32>
    %111 = vector.shape_cast %110 : vector<1x1x1x128xf32> to vector<1x128xf32>
    %112 = vector.broadcast %111 : vector<1x128xf32> to vector<8x128xf32>
    %113 = arith.addf %109, %112 : vector<8x128xf32>
    %cst_107 = arith.constant 0.000000e+00 : f32
    %114 = vector.broadcast %cst_107 : f32 to vector<8x128xf32>
    %115 = arith.maximumf %113, %114 : vector<8x128xf32>
    %116 = arith.truncf %115 : vector<8x128xf32> to vector<8x128xbf16>
    %c2_108 = arith.constant 2 : index
    %c0_109 = arith.constant 0 : index
    %c0_110 = arith.constant 0 : index
    %117 = vector.load %arg6[%c2_108, %c0_109, %c0_110] : memref<3x128x128xbf16, #tpu.memory_space<vmem>>, vector<1x128x128xbf16>
    %118 = vector.shape_cast %117 : vector<1x128x128xbf16> to vector<128x128xbf16>
    %cst_111 = arith.constant dense<0.000000e+00> : vector<8x128xf32>
    %119 = tpu.matmul %116, %118, %cst_111 {dimension_numbers = #tpu.dot_dimension_numbers<[1], [0], [0], [1], [0, 0, 1, 1], [], []>} : vector<8x128xbf16>, vector<128x128xbf16>, vector<8x128xf32> -> vector<8x128xf32>
    %c2_112 = arith.constant 2 : index
    %c0_113 = arith.constant 0 : index
    %c0_114 = arith.constant 0 : index
    %120 = vector.load %arg7[%c2_112, %c0_113, %c0_114] : memref<3x1x128xf32, #tpu.memory_space<vmem>>, vector<1x1x128xf32>
    %121 = vector.shape_cast %120 : vector<1x1x128xf32> to vector<1x128xf32>
    %122 = vector.broadcast %121 : vector<1x128xf32> to vector<8x128xf32>
    %123 = arith.addf %119, %122 : vector<8x128xf32>
    %c0_115 = arith.constant 0 : index
    %c256 = arith.constant 256 : index
    %124 = vector.load %arg8[%c0_115, %c256] : memref<8x384xf32, #tpu.memory_space<vmem>>, vector<8x128xf32>
    tpu.vector_store %arg8[%c0_115, %c256], %123 {strides = array<i32>} : memref<8x384xf32, #tpu.memory_space<vmem>>, vector<8x128xf32>,
    %cst_116 = arith.constant dense<0.000000e+00> : vector<8xf32>
    %125 = vector.multi_reduction <add>, %123, %cst_116 [1] : vector<8x128xf32> to vector<8xf32>
    %126 = vector.shape_cast %125 : vector<8xf32> to vector<8x1xf32>
    %127 = arith.addf %84, %126 : vector<8x1xf32>
    %c0_117 = arith.constant 0 : index
    %c0_118 = arith.constant 0 : index
    %128 = vector.load %arg9[%c0_117, %c0_118] : memref<8x1xf32, #tpu.memory_space<vmem>>, vector<8x1xf32>
    tpu.vector_store %arg9[%c0_117, %c0_118], %127 {strides = array<i32>} : memref<8x1xf32, #tpu.memory_space<vmem>>, vector<8x1xf32>,
    return
  }
  func.func @transform_0(%arg0: i32) -> (i32, i32, i32) {
    %c0_i32 = arith.constant 0 : i32
    %c0_i32_0 = arith.constant 0 : i32
    %c0_i32_1 = arith.constant 0 : i32
    return %c0_i32, %arg0, %c0_i32_0 : i32, i32, i32
  }
  func.func @transform_1(%arg0: i32) -> (i32, i32, i32) {
    %c0_i32 = arith.constant 0 : i32
    %c0_i32_0 = arith.constant 0 : i32
    %c0_i32_1 = arith.constant 0 : i32
    %c0_i32_2 = arith.constant 0 : i32
    return %c0_i32, %c0_i32_0, %c0_i32_1 : i32, i32, i32
  }
  func.func @transform_2(%arg0: i32) -> (i32, i32, i32) {
    %c0_i32 = arith.constant 0 : i32
    %c0_i32_0 = arith.constant 0 : i32
    %c0_i32_1 = arith.constant 0 : i32
    %c0_i32_2 = arith.constant 0 : i32
    return %c0_i32, %c0_i32_0, %c0_i32_1 : i32, i32, i32
  }
  func.func @transform_3(%arg0: i32) -> (i32, i32, i32, i32) {
    %c0_i32 = arith.constant 0 : i32
    %c0_i32_0 = arith.constant 0 : i32
    %c0_i32_1 = arith.constant 0 : i32
    %c0_i32_2 = arith.constant 0 : i32
    %c0_i32_3 = arith.constant 0 : i32
    return %c0_i32, %c0_i32_0, %c0_i32_1, %c0_i32_2 : i32, i32, i32, i32
  }
  func.func @transform_4(%arg0: i32) -> (i32, i32, i32, i32) {
    %c0_i32 = arith.constant 0 : i32
    %c0_i32_0 = arith.constant 0 : i32
    %c0_i32_1 = arith.constant 0 : i32
    %c0_i32_2 = arith.constant 0 : i32
    %c0_i32_3 = arith.constant 0 : i32
    return %c0_i32, %c0_i32_0, %c0_i32_1, %c0_i32_2 : i32, i32, i32, i32
  }
  func.func @transform_5(%arg0: i32) -> (i32, i32, i32) {
    %c0_i32 = arith.constant 0 : i32
    %c0_i32_0 = arith.constant 0 : i32
    %c0_i32_1 = arith.constant 0 : i32
    %c0_i32_2 = arith.constant 0 : i32
    return %c0_i32, %c0_i32_0, %c0_i32_1 : i32, i32, i32
  }
  func.func @transform_6(%arg0: i32) -> (i32, i32, i32) {
    %c0_i32 = arith.constant 0 : i32
    %c0_i32_0 = arith.constant 0 : i32
    %c0_i32_1 = arith.constant 0 : i32
    %c0_i32_2 = arith.constant 0 : i32
    return %c0_i32, %c0_i32_0, %c0_i32_1 : i32, i32, i32
  }
  func.func @transform_7(%arg0: i32) -> (i32, i32) {
    %c0_i32 = arith.constant 0 : i32
    %c0_i32_0 = arith.constant 0 : i32
    return %arg0, %c0_i32 : i32, i32
  }
  func.func @transform_8(%arg0: i32) -> (i32, i32) {
    %c0_i32 = arith.constant 0 : i32
    %c0_i32_0 = arith.constant 0 : i32
    return %arg0, %c0_i32 : i32, i32
  }
}

</mosaic_0001>

<bundles_post_ra>
// kernel: tpu_custom_call.1
= control target key start
LH: loop header
LB: loop body
LE: loop exit
PB: predicated region body
PF: predicated region fallthrough
CT: control target
= control target key end

     0   :  { %14 = vsyncpa [#allocation3], 0  ;;  %s2173_s0 = inlined_call_operand.hbm [shape: bf16[3,8,12], index: 0, kind: input, shape index: {}]   ;;  %s2174_s1 = inlined_call_operand.hbm [shape: bf16[3,12,128], index: 1, kind: input, shape index: {}]   ;;  %s2175_s2 = inlined_call_operand.hbm [shape: f32[3,1,128], index: 2, kind: input, shape index: {}]   ;;  %s2176_s3 = inlined_call_operand.hbm [shape: bf16[3,2,128,128], index: 3, kind: input, shape index: {}]   ;;  %s2177_s4 = inlined_call_operand.vmem [shape: f32[3,2,1,128], index: 4, kind: input, shape index: {}]   ;;  %s2178_s5 = inlined_call_operand.hbm [shape: bf16[3,128,128], index: 5, kind: input, shape index: {}]   ;;  %s2179_s6 = inlined_call_operand.vmem [shape: f32[3,1,128], index: 6, kind: input, shape index: {}]   ;;  %s2180_s7 = inlined_call_operand.hbm [shape: f32[8,384], index: 7, kind: output, shape index: {0}]   ;;  %s2181_s8 = inlined_call_operand.vmem [shape: f32[8,1], index: 8, kind: output, shape index: {1}]  }
   0x1   :  { %15 = vsyncpa [#allocation6], 0 }
   0x2   :  { %16 = vsyncpa [#allocation9], 0 }
   0x3   :  { %17 = vsyncpa [#allocation4], 0  ;;  %s1951_s27 = smov [#allocation5]   ;;  %s1952_s29 = smov [#allocation8]  }
   0x4   :  { %s35_s28 = sshll.u32 %s1951_s27, 4  ;;  %s59_s30 = sshll.u32 %s1952_s29, 4  ;;  %s36_s28 = int_to_ptr.vmem [resolvable:$true] %s35_s28  ;;  %s60_s30 = int_to_ptr.vmem [resolvable:$true] %s59_s30 }
   0x5   :  { %s1831_s9 = scalar_lea.vmem %s36_s28, 384  ;;  %p1836_p1 = scmp.lt.s32.totalorder %s36_s28, %s36_s28 }
   0x6   :  { %p1832_p0 = scmp.ne.s32.totalorder %s36_s28, %s1831_s9  ;;  %p1837_p2 = scmp.lt.s32.totalorder %s1831_s9, %s1831_s9 }
   0x8   :  { %p1838_p3 = por %p1837_p2, %p1836_p1 }
   0xa   :  { %p1839_p4 = pnand %p1838_p3, %p1832_p0 }
   0xc   :  { %1842 = shalt.err (!%p1839_p4)
}
   0xd   :  { %s1953_s10 = smov 64   ;;  %s1954_s11 = smov 4  }
   0xe   :  { %41 = dma.hbm_to_vmem [thread:$0]  %s2174_s1, 384, %s36_s28, [#allocation6], %s1953_s10, %s1953_s10, %s1954_s11  }
   0xf   :  { %s1851_s14 = scalar_lea.vmem %s60_s30, 6144  ;;  %p1856_p6 = scmp.lt.s32.totalorder %s60_s30, %s60_s30 }
  0x10   :  { %p1852_p5 = scmp.ne.s32.totalorder %s60_s30, %s1851_s14  ;;  %p1857_p7 = scmp.lt.s32.totalorder %s1851_s14, %s1851_s14 }
  0x12   :  { %p1858_p8 = por %p1857_p7, %p1856_p6 }
  0x14   :  { %p1859_p9 = pnand %p1858_p8, %p1852_p5 }
  0x16   :  { %1862 = shalt.err (!%p1859_p9)
}
  0x17   :  { %65 = dma.hbm_to_vmem [thread:$0]  %s2176_s3, 6144, %s60_s30, [#allocation9], %s1953_s10, %s1953_s10, %s1954_s11  }
  0x18   :  { %s1955_s17 = smov [#allocation2]   ;;  %s1956_s19 = smov [#allocation7]  }
  0x19   :  { %s23_s18 = sshll.u32 %s1955_s17, 4  ;;  %s47_s20 = sshll.u32 %s1956_s19, 4  ;;  %s24_s18 = int_to_ptr.vmem [resolvable:$true] %s23_s18  ;;  %s48_s20 = int_to_ptr.vmem [resolvable:$true] %s47_s20 }
  0x1a   :  { %s1871_s1 = scalar_lea.vmem %s24_s18, 192  ;;  %p1876_p11 = scmp.lt.s32.totalorder %s24_s18, %s24_s18 }
  0x1b   :  { %p1872_p10 = scmp.ne.s32.totalorder %s24_s18, %s1871_s1  ;;  %p1877_p12 = scmp.lt.s32.totalorder %s1871_s1, %s1871_s1 }
  0x1d   :  { %p1878_p13 = por %p1877_p12, %p1876_p11 }
  0x1f   :  { %p1879_p0 = pnand %p1878_p13, %p1872_p10 }
  0x21   :  { %1882 = shalt.err (!%p1879_p0)
}
  0x22   :  { %29 = dma.hbm_to_vmem [thread:$0]  %s2173_s0, 192, %s24_s18, [#allocation3], %s1953_s10, %s1953_s10, %s1954_s11  }
  0x23   :  { %s1891_s3 = scalar_lea.vmem %s48_s20, 48  ;;  %s1895_s23 = scalar_lea.vmem %s48_s20, 64 }
  0x24   :  { %p1892_p1 = scmp.ne.s32.totalorder %s48_s20, %s1891_s3  ;;  %p1896_p2 = scmp.lt.s32.totalorder %s48_s20, %s48_s20 }
  0x25   :  { %p1897_p3 = scmp.lt.s32.totalorder %s1895_s23, %s1891_s3 }
  0x27   :  { %p1898_p4 = por %p1897_p3, %p1896_p2 }
  0x29   :  { %p1899_p5 = pnand %p1898_p4, %p1892_p1 }
  0x2b   :  { %1902 = shalt.err (!%p1899_p5)
}
  0x2c   :  { %s1957_s24 = smov 16   ;;  %s1958_s25 = smov 1  }
  0x2d   :  { %53 = dma.hbm_to_vmem [thread:$0]  %s2175_s2, 48, %s48_s20, [#allocation6], %s1957_s24, %s1957_s24, %s1958_s25  }
  0x2e   :  { %s1959_s28 = smov [#allocation10]  }
  0x2f   :  { %s73_s29 = sshll.u32 %s1959_s28, 4  ;;  %s74_s29 = int_to_ptr.vmem [resolvable:$true] %s73_s29 }
  0x30   :  { %s1911_s30 = scalar_lea.vmem %s74_s29, 3072  ;;  %p1916_p7 = scmp.lt.s32.totalorder %s74_s29, %s74_s29 }
  0x31   :  { %p1912_p6 = scmp.ne.s32.totalorder %s74_s29, %s1911_s30  ;;  %p1917_p8 = scmp.lt.s32.totalorder %s1911_s30, %s1911_s30 }
  0x33   :  { %p1918_p9 = por %p1917_p8, %p1916_p7 }
  0x35   :  { %p1919_p10 = pnand %p1918_p9, %p1912_p6 }
  0x37   :  { %1922 = shalt.err (!%p1919_p10)
}
  0x38   :  { %79 = dma.hbm_to_vmem [thread:$0]  %s2178_s5, 3072, %s74_s29, [#allocation9], %s1953_s10, %s1953_s10, %s1954_s11  }
  0x39   :  { %1943 = dma.done.wait [#allocation3], 192  }
  0x3a   :  { %1944 = vsyncadd [#allocation3], 4294967104 }
  0x3b   :  { %1945 = dma.done.wait [#allocation6], 432  }
  0x3c   :  { %1946 = vsyncadd [#allocation6], 4294966864 }
  0x3d   :  { %1947 = dma.done.wait [#allocation9], 9216  }
  0x3e   :  { %1948 = vsyncadd [#allocation9], 4294958080  ;;  %v1960_v0 = vmov 0.0   ;;  %vm1961_vm0 = vmmov 0   ;;  %vm117_vm1 = vcmask 1045504   ;;  %vm113_vm2 = vcmask 97280  }
  0x3f   :  { %1538 = vmatprep.subr.bf16.mxu0 %v1960_v0  ;;  %1540 = vmatprep.mubr.msk.bf16.mxu0 %vm1961_vm0, %v1960_v0  ;;  %v1748_v1 = vld [vmem:[#allocation5] sm:$0x3f]   ;;  %v1749_v3 = vld [vmem:[#allocation8 + $0x38] sm:$0xff]   ;;  %v1750_v5 = vld [vmem:[#allocation8 + $0x30] sm:$0xff]  }
  0x40   :  { %1544 = vmatprep.subr.bf16.mxu1 %v1960_v0  ;;  %1560 = vmatprep.mubr.msk.bf16.mxu1 %vm1961_vm0, %v1960_v0  ;;  %v119_v2 = vsel %vm117_vm1, %v1748_v1, 0  ;;  %v98_v4 = vld [vmem:[#allocation2] sm:$0xf]  ;;  %v1751_v6 = vld [vmem:[#allocation8 + $0x28] sm:$0xff]   ;;  %v1752_v7 = vld [vmem:[#allocation8 + $0x20] sm:$0xff]  }
  0x41   :  { %1539 = vmatpush3.bf16.msra.mxu0 %v119_v2  ;;  %1545 = vmatpush3.bf16.msra.mxu1 %v1749_v3  ;;  %v1753_v8 = vld [vmem:[#allocation8 + $0x18] sm:$0xff]   ;;  %v1754_v9 = vld [vmem:[#allocation8 + $0x10] sm:$0xff]   ;;  %v1755_v10 = vld [vmem:[#allocation8 + $0x8] sm:$0xff]  }
  0x42   :  { %1564 = vmatprep.subr.bf16.mxu0 %v1960_v0  ;;  %1546 = vmatprep.subr.bf16.mxu1 %v1960_v0  ;;  %v1756_v11 = vld [vmem:[#allocation8] sm:$0xff]   ;;  %v1757_v12 = vld [vmem:[#allocation8 + $0x78] sm:$0xff]   ;;  %v1758_v13 = vld [vmem:[#allocation8 + $0x70] sm:$0xff]  }
  0x43   :  { %v1759_v14 = vld [vmem:[#allocation8 + $0x68] sm:$0xff]   ;;  %v1760_v15 = vld [vmem:[#allocation8 + $0x60] sm:$0xff]   ;;  %v1761_v16 = vld [vmem:[#allocation8 + $0x58] sm:$0xff]  }
  0x44   :  { %1541 = vmatmul.mubr.msk.bf16.vlgmr.msra.gmra.mxu0 %vm113_vm2, %v98_v4  ;;  %v1762_v17 = vld [vmem:[#allocation8 + $0x50] sm:$0xff]   ;;  %v1763_v18 = vld [vmem:[#allocation8 + $0x48] sm:$0xff]   ;;  %v1354_v19 = vld [vmem:[#allocation7] ss:$0 sm:$0xff] }
  0x45   :  { %1580 = vmatprep.mubr.msk.bf16.mxu0 %vm1961_vm0, %v1960_v0  ;;  %1547 = vmatpush3.bf16.msra.mxu1 %v1750_v5  ;;  %v1764_v27 = vld [vmem:[#allocation8 + $0x40] sm:$0xff]   ;;  %v1766_v28 = vld [vmem:[#allocation10 + $0x38] sm:$0xff]   ;;  %v1767_v29 = vld [vmem:[#allocation10 + $0x30] sm:$0xff]  }
  0x46   :  { %1548 = vmatprep.subr.bf16.mxu1 %v1960_v0  ;;  %1565 = vmatpush3.bf16.msra.mxu0 %v1757_v12  ;;  %v1768_v30 = vld [vmem:[#allocation10 + $0x28] sm:$0xff]   ;;  %v1770_v31 = vld [vmem:[#allocation10 + $0x20] sm:$0xff]   ;;  %v1772_v32 = vld [vmem:[#allocation10 + $0x18] sm:$0xff]  }
  0x47   :  { %1566 = vmatprep.subr.bf16.mxu0 %v1960_v0  ;;  %v1774_v33 = vld [vmem:[#allocation10 + $0x10] sm:$0xff]   ;;  %v1357_v34 = vld [vmem:[%s2177_s4] ss:$0 sm:$0xff]  ;;  %v506_v44 = vld [vmem:[#allocation2 + $0x4] sm:$0xf] }
  0x48   :  { %v1765_v37 = vld [vmem:[#allocation5 + $0x8] sm:$0x3f]   ;;  %v1769_v45 = vld [vmem:[#allocation8 + $0xb8] sm:$0xff]   ;;  %v1775_v48 = vld [vmem:[#allocation8 + $0xa0] sm:$0xff]  }
  0x49   :  { %1549 = vmatpush3.bf16.msra.mxu1 %v1751_v6  ;;  %v527_v42 = vsel %vm117_vm1, %v1765_v37, 0  ;;  %v1771_v46 = vld [vmem:[#allocation8 + $0xb0] sm:$0xff]   ;;  %v1773_v47 = vld [vmem:[#allocation8 + $0xa8] sm:$0xff]   ;;  %v1777_v50 = vld [vmem:[#allocation8 + $0x98] sm:$0xff]  }
  0x4a   :  { %1550 = vmatprep.subr.bf16.mxu1 %v1960_v0  ;;  %1567 = vmatpush3.bf16.msra.mxu0 %v1758_v13  ;;  %v1776_v49 = vld [vmem:[#allocation10 + $0x8] sm:$0xff]   ;;  %v1778_v51 = vld [vmem:[#allocation10] sm:$0xff]   ;;  %v1779_v52 = vld [vmem:[#allocation8 + $0x90] sm:$0xff]  }
  0x4b   :  { %1568 = vmatprep.subr.bf16.mxu0 %v1960_v0  ;;  %v1780_v53 = vld [vmem:[#allocation8 + $0x88] sm:$0xff]   ;;  %v1781_v54 = vld [vmem:[#allocation8 + $0x80] sm:$0xff]   ;;  %v1367_v55 = vld [vmem:[%s2177_s4 + $0x1] ss:$0 sm:$0xff] }
  0x4c   :  { %v1782_v61 = vld [vmem:[#allocation8 + $0xf8] sm:$0xff]   ;;  %v1783_v3 = vld [vmem:[#allocation8 + $0xf0] sm:$0xff]   ;;  %v1797_v37 = vld [vmem:[#allocation10 + $0x40] sm:$0xff]  }
  0x4d   :  { %1551 = vmatpush3.bf16.msra.mxu1 %v1752_v7  ;;  %v1385_v1 = vld [vmem:[#allocation7 + $0x1] ss:$0 sm:$0xff]  ;;  %v1787_v13 = vld [vmem:[#allocation8 + $0xd0] sm:$0xff]  }
  0x4e   :  { %1552 = vmatprep.subr.bf16.mxu1 %v1960_v0  ;;  %1569 = vmatpush3.bf16.msra.mxu0 %v1759_v14  ;;  %v1786_v12 = vld [vmem:[#allocation8 + $0xd8] sm:$0xff]   ;;  %v1788_v14 = vld [vmem:[#allocation8 + $0xc8] sm:$0xff]  }
  0x4f   :  { %1570 = vmatprep.subr.bf16.mxu0 %v1960_v0 }
  0x51   :  { %1553 = vmatpush3.bf16.msra.mxu1 %v1753_v8  ;;  %v1784_v8 = vld [vmem:[#allocation8 + $0xe8] sm:$0xff]  }
  0x52   :  { %1554 = vmatprep.subr.bf16.mxu1 %v1960_v0  ;;  %1571 = vmatpush3.bf16.msra.mxu0 %v1760_v15  ;;  %v1789_v15 = vld [vmem:[#allocation8 + $0xc0] sm:$0xff]  }
  0x53   :  { %1572 = vmatprep.subr.bf16.mxu0 %v1960_v0 }
  0x55   :  { %1555 = vmatpush3.bf16.msra.mxu1 %v1754_v9 }
  0x56   :  { %1556 = vmatprep.subr.bf16.mxu1 %v1960_v0  ;;  %1573 = vmatpush3.bf16.msra.mxu0 %v1761_v16  ;;  %v1376_v16 = vld [vmem:[%s2179_s6] ss:$0 sm:$0xff] }
  0x57   :  { %1574 = vmatprep.subr.bf16.mxu0 %v1960_v0 }
  0x59   :  { %1557 = vmatpush3.bf16.msra.mxu1 %v1755_v10 }
  0x5a   :  { %1558 = vmatprep.subr.bf16.mxu1 %v1960_v0  ;;  %1575 = vmatpush3.bf16.msra.mxu0 %v1762_v17 }
  0x5b   :  { %1576 = vmatprep.subr.bf16.mxu0 %v1960_v0 }
  0x5d   :  { %1559 = vmatpush3.bf16.msra.mxu1 %v1756_v11  ;;  %v1785_v11 = vld [vmem:[#allocation8 + $0xe0] sm:$0xff]  }
  0x5e   :  { %1584 = vmatprep.subr.bf16.mxu1 %v1960_v0  ;;  %1577 = vmatpush3.bf16.msra.mxu0 %v1763_v18 }
  0x5f   :  { %1578 = vmatprep.subr.bf16.mxu0 %v1960_v0 }
  0x62   :  { %1579 = vmatpush3.bf16.msra.mxu0 %v1764_v27 }
  0x63   :  { %1604 = vmatprep.subr.bf16.mxu0 %v1960_v0 }
 0x104   :  { %v155_v20 = vpop.f32.mrf.mxu0 }
 0x105   :  { %v156_v21 = vadd.f32 %v1354_v19, %v155_v20 }
 0x106   :  { %v1542_v22 = vpop.f32.mrf.mxu0 }
 0x107   :  { %v161_v23 = vmax.f32 %v156_v21, 0.0  ;;  %v1389_v22 = vld [vmem:[%s2177_s4 + $0x2] ss:$0 sm:$0xff] }
 0x108   :  { %v158_v24 = vpop.f32.mrf.mxu0 }
 0x109   :  { %v162_v25 = vpack.c.bf16 %v161_v23, %v161_v23 }
 0x10a   :  { %v1543_v26 = vpop.f32.mrf.mxu0 }
 0x10b   :  { %1561 = vmatmul.mubr.bf16.vlgmr.msra.gmra.mxu1 %v162_v25 }
 0x10c   :  { %1600 = vmatprep.mubr.msk.bf16.mxu1 %vm1961_vm0, %v1960_v0  ;;  %1585 = vmatpush3.bf16.msra.mxu1 %v1766_v28  ;;  %v1790_v28 = vld [vmem:[#allocation10 + $0x78] sm:$0xff]  }
 0x10d   :  { %1586 = vmatprep.subr.bf16.mxu1 %v1960_v0 }
 0x110   :  { %1587 = vmatpush3.bf16.msra.mxu1 %v1767_v29 }
 0x111   :  { %1588 = vmatprep.subr.bf16.mxu1 %v1960_v0 }
 0x114   :  { %1589 = vmatpush3.bf16.msra.mxu1 %v1768_v30 }
 0x115   :  { %1590 = vmatprep.subr.bf16.mxu1 %v1960_v0 }
 0x118   :  { %1591 = vmatpush3.bf16.msra.mxu1 %v1770_v31  ;;  %v1791_v31 = vld [vmem:[#allocation10 + $0x70] sm:$0xff]  }
 0x119   :  { %1592 = vmatprep.subr.bf16.mxu1 %v1960_v0 }
 0x11c   :  { %1593 = vmatpush3.bf16.msra.mxu1 %v1772_v32  ;;  %v1792_v32 = vld [vmem:[#allocation10 + $0x68] sm:$0xff]  }
 0x11d   :  { %1594 = vmatprep.subr.bf16.mxu1 %v1960_v0 }
 0x120   :  { %1595 = vmatpush3.bf16.msra.mxu1 %v1774_v33  ;;  %v1793_v33 = vld [vmem:[#allocation10 + $0x60] sm:$0xff]  }
 0x121   :  { %1596 = vmatprep.subr.bf16.mxu1 %v1960_v0 }
 0x124   :  { %1597 = vmatpush3.bf16.msra.mxu1 %v1776_v49 }
 0x125   :  { %1598 = vmatprep.subr.bf16.mxu1 %v1960_v0 }
 0x128   :  { %1599 = vmatpush3.bf16.msra.mxu1 %v1778_v51 }
 0x129   :  { %1630 = vmatprep.subr.bf16.mxu1 %v1960_v0 }
 0x1cb   :  { %v268_v35 = vpop.f32.mrf.mxu1 }
 0x1cc   :  { %v269_v36 = vadd.f32 %v1357_v34, %v268_v35  ;;  %v1794_v34 = vld [vmem:[#allocation10 + $0x58] sm:$0xff]   ;;  %v1795_v35 = vld [vmem:[#allocation10 + $0x50] sm:$0xff]  }
 0x1cd   :  { %v1562_v38 = vpop.f32.mrf.mxu1 }
 0x1ce   :  { %v274_v39 = vmax.f32 %v269_v36, 0.0  ;;  %v1796_v36 = vld [vmem:[#allocation10 + $0x48] sm:$0xff]   ;;  %v1799_v38 = vld [vmem:[#allocation8 + $0x138] sm:$0xff]  }
 0x1cf   :  { %v271_v40 = vpop.f32.mrf.mxu1 }
 0x1d0   :  { %v275_v41 = vpack.c.bf16 %v274_v39, %v274_v39  ;;  %v1800_v39 = vld [vmem:[#allocation8 + $0x130] sm:$0xff]   ;;  %v1801_v40 = vld [vmem:[#allocation8 + $0x128] sm:$0xff]  }
 0x1d1   :  { %v1563_v43 = vpop.f32.mrf.mxu1 }
 0x1d2   :  { %1581 = vmatmul.mubr.bf16.vlgmr.msra.gmra.mxu0 %v275_v41  ;;  %v1802_v41 = vld [vmem:[#allocation8 + $0x120] sm:$0xff]  }
 0x1d3   :  { %1605 = vmatpush3.bf16.msra.mxu0 %v527_v42  ;;  %1606 = vmatprep.mubr.msk.bf16.mxu0 %vm1961_vm0, %v1960_v0  ;;  %v1399_v42 = vld [vmem:[%s2177_s4 + $0x3] ss:$0 sm:$0xff] }
 0x1d4   :  { %1610 = vmatprep.subr.bf16.mxu0 %v1960_v0 }
 0x1da   :  { %1607 = vmatmul.mubr.msk.bf16.vlgmr.msra.gmra.mxu0 %vm113_vm2, %v506_v44 }
 0x1db   :  { %1611 = vmatpush3.bf16.msra.mxu0 %v1769_v45  ;;  %1626 = vmatprep.mubr.msk.bf16.mxu0 %vm1961_vm0, %v1960_v0  ;;  %v1798_v45 = vld [vmem:[#allocation5 + $0x10] sm:$0x3f]  }
 0x1dc   :  { %1612 = vmatprep.subr.bf16.mxu0 %v1960_v0 }
 0x1df   :  { %1613 = vmatpush3.bf16.msra.mxu0 %v1771_v46 }
 0x1e0   :  { %1614 = vmatprep.subr.bf16.mxu0 %v1960_v0 }
 0x1e3   :  { %1615 = vmatpush3.bf16.msra.mxu0 %v1773_v47 }
 0x1e4   :  { %1616 = vmatprep.subr.bf16.mxu0 %v1960_v0 }
 0x1e7   :  { %1617 = vmatpush3.bf16.msra.mxu0 %v1775_v48 }
 0x1e8   :  { %1618 = vmatprep.subr.bf16.mxu0 %v1960_v0 }
 0x1eb   :  { %1619 = vmatpush3.bf16.msra.mxu0 %v1777_v50  ;;  %v940_v50 = vsel %vm117_vm1, %v1798_v45, 0 }
 0x1ec   :  { %1620 = vmatprep.subr.bf16.mxu0 %v1960_v0 }
 0x1ef   :  { %1621 = vmatpush3.bf16.msra.mxu0 %v1779_v52  ;;  %v919_v52 = vld [vmem:[#allocation2 + $0x8] sm:$0xf] }
 0x1f0   :  { %1622 = vmatprep.subr.bf16.mxu0 %v1960_v0 }
 0x1f3   :  { %1623 = vmatpush3.bf16.msra.mxu0 %v1780_v53  ;;  %v1803_v53 = vld [vmem:[#allocation8 + $0x118] sm:$0xff]  }
 0x1f4   :  { %1624 = vmatprep.subr.bf16.mxu0 %v1960_v0 }
 0x1f7   :  { %1625 = vmatpush3.bf16.msra.mxu0 %v1781_v54  ;;  %v1804_v54 = vld [vmem:[#allocation8 + $0x110] sm:$0xff]  }
 0x1f8   :  { %1650 = vmatprep.subr.bf16.mxu0 %v1960_v0 }
 0x292   :  { %v383_v56 = vpop.f32.mrf.mxu0 }
 0x293   :  { %v384_v57 = vadd.f32 %v1367_v55, %v383_v56  ;;  %v1805_v55 = vld [vmem:[#allocation8 + $0x108] sm:$0xff]   ;;  %v1806_v56 = vld [vmem:[#allocation8 + $0x100] sm:$0xff]  }
 0x294   :  { %v1582_v58 = vpop.f32.mrf.mxu0 }
 0x295   :  { %v389_v59 = vmax.f32 %v384_v57, 0.0  ;;  %v1409_v57 = vld [vmem:[%s2179_s6 + $0x1] ss:$0 sm:$0xff] }
 0x296   :  { %v386_v60 = vpop.f32.mrf.mxu0 }
 0x297   :  { %v390_v62 = vpack.c.bf16 %v389_v59, %v389_v59 }
 0x298   :  { %v1583_v63 = vpop.f32.mrf.mxu0 }
 0x299   :  { %1601 = vmatmul.mubr.bf16.vlgmr.msra.gmra.mxu1 %v390_v62  ;;  %v1418_v63 = vld [vmem:[#allocation7 + $0x2] ss:$0 sm:$0xff] }
 0x29a   :  { %v563_v2 = vpop.f32.mrf.mxu0  ;;  %1631 = vmatpush3.bf16.msra.mxu1 %v1782_v61  ;;  %1646 = vmatprep.mubr.msk.bf16.mxu1 %vm1961_vm0, %v1960_v0 }
 0x29b   :  { %v564_v4 = vadd.f32 %v1385_v1, %v563_v2  ;;  %1632 = vmatprep.subr.bf16.mxu1 %v1960_v0 }
 0x29c   :  { %v1608_v5 = vpop.f32.mrf.mxu0 }
 0x29d   :  { %v569_v6 = vmax.f32 %v564_v4, 0.0 }
 0x29e   :  { %v566_v7 = vpop.f32.mrf.mxu0  ;;  %1633 = vmatpush3.bf16.msra.mxu1 %v1783_v3 }
 0x29f   :  { %v570_v9 = vpack.c.bf16 %v569_v6, %v569_v6  ;;  %1634 = vmatprep.subr.bf16.mxu1 %v1960_v0  ;;  %v1807_v7 = vld [vmem:[#allocation8 + $0x178] sm:$0xff]  }
 0x2a0   :  { %v1609_v10 = vpop.f32.mrf.mxu0 }
 0x2a1   :  { %1627 = vmatmul.mubr.bf16.vlgmr.msra.gmra.mxu0 %v570_v9  ;;  %v1808_v9 = vld [vmem:[#allocation8 + $0x170] sm:$0xff]   ;;  %v1809_v10 = vld [vmem:[#allocation8 + $0x168] sm:$0xff]  }
 0x2a2   :  { %1635 = vmatpush3.bf16.msra.mxu1 %v1784_v8  ;;  %1666 = vmatprep.mubr.msk.bf16.mxu0 %vm1961_vm0, %v1960_v0 }
 0x2a3   :  { %1636 = vmatprep.subr.bf16.mxu1 %v1960_v0  ;;  %1651 = vmatpush3.bf16.msra.mxu0 %v1790_v28 }
 0x2a4   :  { %1652 = vmatprep.subr.bf16.mxu0 %v1960_v0 }
 0x2a6   :  { %1637 = vmatpush3.bf16.msra.mxu1 %v1785_v11  ;;  %v1810_v11 = vld [vmem:[#allocation8 + $0x160] sm:$0xff]  }
 0x2a7   :  { %1638 = vmatprep.subr.bf16.mxu1 %v1960_v0  ;;  %1653 = vmatpush3.bf16.msra.mxu0 %v1791_v31  ;;  %v1822_v31 = vld [vmem:[#allocation10 + $0x80] sm:$0xff]  }
 0x2a8   :  { %1654 = vmatprep.subr.bf16.mxu0 %v1960_v0 }
 0x2aa   :  { %1639 = vmatpush3.bf16.msra.mxu1 %v1786_v12  ;;  %v1811_v12 = vld [vmem:[#allocation8 + $0x158] sm:$0xff]  }
 0x2ab   :  { %1640 = vmatprep.subr.bf16.mxu1 %v1960_v0  ;;  %1655 = vmatpush3.bf16.msra.mxu0 %v1792_v32  ;;  %v1432_v32 = vld [vmem:[%s2177_s4 + $0x5] ss:$0 sm:$0xff] }
 0x2ac   :  { %1656 = vmatprep.subr.bf16.mxu0 %v1960_v0 }
 0x2ae   :  { %1641 = vmatpush3.bf16.msra.mxu1 %v1787_v13  ;;  %v1812_v13 = vld [vmem:[#allocation8 + $0x150] sm:$0xff]  }
 0x2af   :  { %1642 = vmatprep.subr.bf16.mxu1 %v1960_v0  ;;  %1657 = vmatpush3.bf16.msra.mxu0 %v1793_v33 }
 0x2b0   :  { %1658 = vmatprep.subr.bf16.mxu0 %v1960_v0 }
 0x2b2   :  { %1643 = vmatpush3.bf16.msra.mxu1 %v1788_v14  ;;  %v1813_v14 = vld [vmem:[#allocation8 + $0x148] sm:$0xff]  }
 0x2b3   :  { %1644 = vmatprep.subr.bf16.mxu1 %v1960_v0  ;;  %1659 = vmatpush3.bf16.msra.mxu0 %v1794_v34 }
 0x2b4   :  { %1660 = vmatprep.subr.bf16.mxu0 %v1960_v0 }
 0x2b6   :  { %1645 = vmatpush3.bf16.msra.mxu1 %v1789_v15  ;;  %v1814_v15 = vld [vmem:[#allocation8 + $0x140] sm:$0xff]  }
 0x2b7   :  { %1676 = vmatprep.subr.bf16.mxu1 %v1960_v0  ;;  %1661 = vmatpush3.bf16.msra.mxu0 %v1795_v35 }
 0x2b8   :  { %1662 = vmatprep.subr.bf16.mxu0 %v1960_v0 }
 0x2bb   :  { %1663 = vmatpush3.bf16.msra.mxu0 %v1796_v36 }
 0x2bc   :  { %1664 = vmatprep.subr.bf16.mxu0 %v1960_v0 }
 0x2bf   :  { %1665 = vmatpush3.bf16.msra.mxu0 %v1797_v37 }
 0x2c0   :  { %1670 = vmatprep.subr.bf16.mxu0 %v1960_v0 }
 0x359   :  { %v496_v17 = vpop.f32.mrf.mxu1 }
 0x35a   :  { %v497_v18 = vadd.f32 %v1376_v16, %v496_v17  ;;  %v1815_v16 = vld [vmem:[#allocation10 + $0xb8] sm:$0xff]   ;;  %v1816_v17 = vld [vmem:[#allocation10 + $0xb0] sm:$0xff]  }
 0x35b   :  { %v1602_v19 = vpop.f32.mrf.mxu1 }
 0x35c   :  { %502 = vst [vmem:[#allocation11] sm:$0xff] %v497_v18  ;;  %503 = vadd.xlane.f32.xlu0 %v497_v18  ;;  %v1817_v18 = vld [vmem:[#allocation10 + $0xa8] sm:$0xff]   ;;  %v1818_v19 = vld [vmem:[#allocation10 + $0xa0] sm:$0xff]  }
 0x35d   :  { %v499_v20 = vpop.f32.mrf.mxu1 }
 0x35e   :  { %v1819_v20 = vld [vmem:[#allocation10 + $0x98] sm:$0xff]  }
 0x35f   :  { %v1603_v21 = vpop.f32.mrf.mxu1 }
 0x360   :  { %v1820_v21 = vld [vmem:[#allocation10 + $0x90] sm:$0xff]  }
 0x361   :  { %v678_v23 = vpop.f32.mrf.mxu0 }
 0x362   :  { %v679_v24 = vadd.f32 %v1389_v22, %v678_v23  ;;  %v1422_v22 = vld [vmem:[%s2177_s4 + $0x4] ss:$0 sm:$0xff]  ;;  %s1962_s4 = smov [#allocation11]  }
 0x363   :  { %v1628_v25 = vpop.f32.mrf.mxu0  ;;  %s1339_s24 = sshll.u32 %s1962_s4, 4  ;;  %s1340_s24 = int_to_ptr.vmem [resolvable:$true] %s1339_s24 }
 0x364   :  { %v684_v26 = vmax.f32 %v679_v24, 0.0  ;;  %s1923_s25 = scalar_lea.vmem %s1340_s24, 384  ;;  %p1928_p12 = scmp.lt.s32.totalorder %s1340_s24, %s1340_s24 }
 0x365   :  { %v681_v27 = vpop.f32.mrf.mxu0  ;;  %p1924_p11 = scmp.ne.s32.totalorder %s1340_s24, %s1923_s25  ;;  %p1929_p13 = scmp.lt.s32.totalorder %s1923_s25, %s1923_s25 }
 0x366   :  { %v685_v29 = vpack.c.bf16 %v684_v26, %v684_v26 }
 0x367   :  { %v1629_v30 = vpop.f32.mrf.mxu0  ;;  %p1930_p0 = por %p1929_p13, %p1928_p12 }
 0x368   :  { %1647 = vmatmul.mubr.bf16.vlgmr.msra.gmra.mxu1 %v685_v29  ;;  %v1821_v30 = vld [vmem:[#allocation10 + $0x88] sm:$0xff]  }
 0x369   :  { %1692 = vmatprep.mubr.msk.bf16.mxu1 %vm1961_vm0, %v1960_v0  ;;  %1677 = vmatpush3.bf16.msra.mxu1 %v1799_v38  ;;  %p1931_p1 = pnand %p1930_p0, %p1924_p11 }
 0x36a   :  { %1678 = vmatprep.subr.bf16.mxu1 %v1960_v0 }
 0x36d   :  { %1679 = vmatpush3.bf16.msra.mxu1 %v1800_v39 }
 0x36e   :  { %1680 = vmatprep.subr.bf16.mxu1 %v1960_v0 }
 0x371   :  { %1681 = vmatpush3.bf16.msra.mxu1 %v1801_v40  ;;  %v1442_v40 = vld [vmem:[%s2179_s6 + $0x2] ss:$0 sm:$0xff] }
 0x372   :  { %1682 = vmatprep.subr.bf16.mxu1 %v1960_v0 }
 0x375   :  { %1683 = vmatpush3.bf16.msra.mxu1 %v1802_v41 }
 0x376   :  { %1684 = vmatprep.subr.bf16.mxu1 %v1960_v0 }
 0x379   :  { %1685 = vmatpush3.bf16.msra.mxu1 %v1803_v53 }
 0x37a   :  { %1686 = vmatprep.subr.bf16.mxu1 %v1960_v0 }
 0x37d   :  { %1687 = vmatpush3.bf16.msra.mxu1 %v1804_v54 }
 0x37e   :  { %1688 = vmatprep.subr.bf16.mxu1 %v1960_v0 }
 0x381   :  { %1689 = vmatpush3.bf16.msra.mxu1 %v1805_v55 }
 0x382   :  { %1690 = vmatprep.subr.bf16.mxu1 %v1960_v0 }
 0x385   :  { %1691 = vmatpush3.bf16.msra.mxu1 %v1806_v56 }
 0x386   :  { %1716 = vmatprep.subr.bf16.mxu1 %v1960_v0 }
 0x428   :  { %v793_v43 = vpop.f32.mrf.mxu1 }
 0x429   :  { %v794_v44 = vadd.f32 %v1399_v42, %v793_v43 }
 0x42a   :  { %v1648_v46 = vpop.f32.mrf.mxu1 }
 0x42b   :  { %v799_v47 = vmax.f32 %v794_v44, 0.0 }
 0x42c   :  { %v796_v48 = vpop.f32.mrf.mxu1 }
 0x42d   :  { %v800_v49 = vpack.c.bf16 %v799_v47, %v799_v47 }
 0x42e   :  { %v1649_v51 = vpop.f32.mrf.mxu1 }
 0x42f   :  { %1667 = vmatmul.mubr.bf16.vlgmr.msra.gmra.mxu0 %v800_v49 }
 0x430   :  { %1671 = vmatpush3.bf16.msra.mxu0 %v940_v50  ;;  %1672 = vmatprep.mubr.msk.bf16.mxu0 %vm1961_vm0, %v1960_v0 }
 0x431   :  { %1696 = vmatprep.subr.bf16.mxu0 %v1960_v0 }
 0x437   :  { %1673 = vmatmul.mubr.msk.bf16.vlgmr.msra.gmra.mxu0 %vm113_vm2, %v919_v52 }
 0x438   :  { %1712 = vmatprep.mubr.msk.bf16.mxu0 %vm1961_vm0, %v1960_v0  ;;  %1697 = vmatpush3.bf16.msra.mxu0 %v1807_v7 }
 0x439   :  { %1698 = vmatprep.subr.bf16.mxu0 %v1960_v0 }
 0x43c   :  { %1699 = vmatpush3.bf16.msra.mxu0 %v1808_v9 }
 0x43d   :  { %1700 = vmatprep.subr.bf16.mxu0 %v1960_v0 }
 0x440   :  { %1701 = vmatpush3.bf16.msra.mxu0 %v1809_v10 }
 0x441   :  { %1702 = vmatprep.subr.bf16.mxu0 %v1960_v0 }
 0x444   :  { %1703 = vmatpush3.bf16.msra.mxu0 %v1810_v11 }
 0x445   :  { %1704 = vmatprep.subr.bf16.mxu0 %v1960_v0 }
 0x448   :  { %1705 = vmatpush3.bf16.msra.mxu0 %v1811_v12 }
 0x449   :  { %1706 = vmatprep.subr.bf16.mxu0 %v1960_v0 }
 0x44c   :  { %1707 = vmatpush3.bf16.msra.mxu0 %v1812_v13 }
 0x44d   :  { %1708 = vmatprep.subr.bf16.mxu0 %v1960_v0 }
 0x450   :  { %1709 = vmatpush3.bf16.msra.mxu0 %v1813_v14 }
 0x451   :  { %1710 = vmatprep.subr.bf16.mxu0 %v1960_v0 }
 0x454   :  { %1711 = vmatpush3.bf16.msra.mxu0 %v1814_v15 }
 0x4ef   :  { %v908_v58 = vpop.f32.mrf.mxu0 }
 0x4f0   :  { %v909_v59 = vadd.f32 %v1409_v57, %v908_v58 }
 0x4f1   :  { %v1668_v60 = vpop.f32.mrf.mxu0 }
 0x4f2   :  { %914 = vst [vmem:[#allocation11 + $0x8] sm:$0xff] %v909_v59  ;;  %915 = vadd.xlane.f32.xlu0 %v909_v59 }
 0x4f3   :  { %v911_v61 = vpop.f32.mrf.mxu0 }
 0x4f5   :  { %v1669_v62 = vpop.f32.mrf.mxu0 }
 0x4f7   :  { %v976_v1 = vpop.f32.mrf.mxu0 }
 0x4f8   :  { %v977_v2 = vadd.f32 %v1418_v63, %v976_v1 }
 0x4f9   :  { %v1674_v3 = vpop.f32.mrf.mxu0 }
 0x4fa   :  { %v982_v4 = vmax.f32 %v977_v2, 0.0 }
 0x4fb   :  { %v979_v5 = vpop.f32.mrf.mxu0 }
 0x4fc   :  { %v983_v6 = vpack.c.bf16 %v982_v4, %v982_v4 }
 0x4fd   :  { %v1675_v8 = vpop.f32.mrf.mxu0 }
 0x4fe   :  { %1693 = vmatmul.mubr.bf16.vlgmr.msra.gmra.mxu1 %v983_v6 }
 0x4ff   :  { %1732 = vmatprep.mubr.msk.bf16.mxu1 %vm1961_vm0, %v1960_v0  ;;  %1717 = vmatpush3.bf16.msra.mxu1 %v1815_v16 }
 0x500   :  { %1718 = vmatprep.subr.bf16.mxu1 %v1960_v0 }
 0x503   :  { %1719 = vmatpush3.bf16.msra.mxu1 %v1816_v17 }
 0x504   :  { %1720 = vmatprep.subr.bf16.mxu1 %v1960_v0 }
 0x507   :  { %1721 = vmatpush3.bf16.msra.mxu1 %v1817_v18 }
 0x508   :  { %1722 = vmatprep.subr.bf16.mxu1 %v1960_v0 }
 0x50b   :  { %1723 = vmatpush3.bf16.msra.mxu1 %v1818_v19 }
 0x50c   :  { %1724 = vmatprep.subr.bf16.mxu1 %v1960_v0 }
 0x50f   :  { %1725 = vmatpush3.bf16.msra.mxu1 %v1819_v20 }
 0x510   :  { %1726 = vmatprep.subr.bf16.mxu1 %v1960_v0 }
 0x513   :  { %1727 = vmatpush3.bf16.msra.mxu1 %v1820_v21 }
 0x514   :  { %1728 = vmatprep.subr.bf16.mxu1 %v1960_v0 }
 0x517   :  { %1729 = vmatpush3.bf16.msra.mxu1 %v1821_v30 }
 0x518   :  { %1730 = vmatprep.subr.bf16.mxu1 %v1960_v0 }
 0x51b   :  { %1731 = vmatpush3.bf16.msra.mxu1 %v1822_v31 }
 0x5be   :  { %v1091_v23 = vpop.f32.mrf.mxu1 }
 0x5bf   :  { %v1092_v24 = vadd.f32 %v1422_v22, %v1091_v23 }
 0x5c0   :  { %v1694_v25 = vpop.f32.mrf.mxu1 }
 0x5c1   :  { %v1097_v26 = vmax.f32 %v1092_v24, 0.0 }
 0x5c2   :  { %v1094_v27 = vpop.f32.mrf.mxu1 }
 0x5c3   :  { %v1098_v28 = vpack.c.bf16 %v1097_v26, %v1097_v26 }
 0x5c4   :  { %v1695_v29 = vpop.f32.mrf.mxu1 }
 0x5c5   :  { %1713 = vmatmul.mubr.bf16.vlgmr.msra.gmra.mxu0 %v1098_v28 }
 0x685   :  { %v1206_v33 = vpop.f32.mrf.mxu0 }
 0x686   :  { %v1207_v34 = vadd.f32 %v1432_v32, %v1206_v33 }
 0x687   :  { %v1714_v35 = vpop.f32.mrf.mxu0 }
 0x688   :  { %v1212_v36 = vmax.f32 %v1207_v34, 0.0 }
 0x689   :  { %v1209_v37 = vpop.f32.mrf.mxu0 }
 0x68a   :  { %v1213_v38 = vpack.c.bf16 %v1212_v36, %v1212_v36 }
 0x68b   :  { %v1715_v39 = vpop.f32.mrf.mxu0 }
 0x68c   :  { %1733 = vmatmul.mubr.bf16.vlgmr.msra.gmra.mxu1 %v1213_v38 }
 0x74c   :  { %v1321_v41 = vpop.f32.mrf.mxu1 }
 0x74d   :  { %v1322_v0 = vadd.f32 %v1442_v40, %v1321_v41 }
 0x74e   :  { %v1734_v42 = vpop.f32.mrf.mxu1 }
 0x74f   :  { %1327 = vst [vmem:[#allocation11 + $0x10] sm:$0xff] %v1322_v0  ;;  %1328 = vadd.xlane.f32.xlu1 %v1322_v0 }
 0x750   :  { %v1324_v43 = vpop.f32.mrf.mxu1 }
 0x752   :  { %v1735_v44 = vpop.f32.mrf.mxu1 }
 0x753   :  { %1934 = shalt.err (!%p1931_p1)
}
 0x754   :  { %1342 = dma.vmem_to_hbm [thread:$0]  %s1340_s24, 384, %s2180_s7, [#allocation4]   ;;  %v504_v45 = vpop.xlane.xlu0 %503  ;;  %vm1331_vm3 = vcmask 7168  }
 0x758   :  { %v916_v46 = vpop.xlane.xlu0 %915 }
 0x759   :  { %v917_v47 = vadd.f32 %v916_v46, %v504_v45 }
 0x7d8   :  { %v1329_v48 = vpop.xlane.xlu1 %1328 }
 0x7d9   :  { %v1330_v49 = vadd.f32 %v1329_v48, %v917_v47 }
 0x7db   :  { %1332 = vst.msk [vmem:[%s2181_s8] sm:$0xff] %vm1331_vm3, %v1330_v49 }
 0x7dc   :  { %1949 = dma.done.wait [#allocation4], 384  }
 0x7dd   :  { %1950 = vsyncadd [#allocation4], 4294966912 }
 0x7de   :  { %1350 = vsyncpa [#allocation3], 1 }
 0x7df   :  { %1351 = vsyncpa [#allocation6], 1 }
 0x7e0   :  { %1352 = vsyncpa [#allocation9], 1 }
 0x7e1   :  { %1353 = vsyncpa [#allocation4], 1 }

</bundles_post_ra>
